<compile_context>
chip_gen: v6e
topology: v6e:2x2x1
jax: 0.10.0
libtpu: 0.0.40
codegen_flags: <defaults>
</compile_context>

<pallas_src>
import jax
import jax.numpy as jnp
from jax.experimental import pallas as pl
from jax.experimental.pallas import tpu as pltpu


def _attn_kernel(x_ref, wqkv_ref, bqkv_ref, o_ref):
    """One grid step: a (Bt, S, Ep) batch block of lane-padded inputs.

    x_ref:    (Bt, S, Ep)  f32   (Ep = embed_dim padded up to a multiple of 128)
    wqkv_ref: (Ep, 3*Ep)   bf16  fused [Wq | Wk | Wv] panels, 1/sqrt(E) folded into Wq
    bqkv_ref: (1, 3*Ep)    f32   fused bias, 1/sqrt(E) folded into bq
    o_ref:    (Bt, S, Ep)  f32
    """
    Bt, S, Ep = x_ref.shape
    x = x_ref[...]                                        # f32, kept for the residual

    # Fused QKV projection: batch folded into the MXU M dim, bf16 operands,
    # f32 accumulation.
    x2 = x.reshape(Bt * S, Ep).astype(jnp.bfloat16)
    qkv = jnp.dot(x2, wqkv_ref[...], preferred_element_type=jnp.float32)
    qkv = (qkv + bqkv_ref[...]).reshape(Bt, S, 3 * Ep)    # (Bt, S, 3Ep) f32

    # Ep is a multiple of 128 -> each slice is a whole 128-lane panel (free view).
    q = qkv[:, :, 0 * Ep:1 * Ep].astype(jnp.bfloat16)
    k = qkv[:, :, 1 * Ep:2 * Ep].astype(jnp.bfloat16)
    v = qkv[:, :, 2 * Ep:3 * Ep].astype(jnp.bfloat16)

    # Batched scores (Bt, S, S): contract the last dims directly (no k.T copy).
    # The 1/sqrt(E) scale is already folded into Wq / bq at weight-prep time.
    scores = jnp.einsum("bqe,bke->bqk", q, k, preferred_element_type=jnp.float32)

    # Numerically-stable softmax over the last dim (matches F.softmax(dim=-1)).
    # Elementwise math stays f32 (v5e's VPU/EUP has no bf16 path).  The EUP
    # approximate reciprocal is accurate enough for softmax weights.
    m = jnp.max(scores, axis=-1, keepdims=True)
    ex = jnp.exp(scores - m)
    denom = jnp.sum(ex, axis=-1, keepdims=True)
    attn = ex * pl.reciprocal(denom, approx=True)

    # attn @ v (bf16 MXU operands, f32 accumulation) + residual.
    out = jnp.einsum("bqk,bke->bqe", attn.astype(jnp.bfloat16), v,
                     preferred_element_type=jnp.float32) + x
    o_ref[...] = out.astype(o_ref.dtype)
    # TODO(synk): for large S (where Bt*S^2 scores no longer fit VMEM, esp. v7x's
    # 64 MiB) add a KV-tiled "arbitrary" grid axis with flash-style online softmax
    # (m/l/acc in VMEM scratch) instead of materializing the full (Bt, S, S) block.


def prepare_atom_attention_params(wq, bq, wk, bk, wv, bv):
    """One-time weight preparation (hoisted out of the per-call path).

    Takes torch.nn.Linear-style parameters (W: (out, in), b: (out,)) and returns a
    fused, lane-padded, bf16 weight panel plus f32 bias:
        wqkv: (Ep, 3*Ep) bf16,  bqkv: (1, 3*Ep) f32
    with the 1/sqrt(E) attention scale folded into the query projection.
    """
    E = wq.shape[0]
    Ep = ((E + 127) // 128) * 128
    pad = Ep - E
    scale = 1.0 / (E ** 0.5)

    def panel(w):  # torch Linear W is (out, in); y = x @ W.T + b -> store (in, out)
        return jnp.pad(w.T, ((0, pad), (0, pad)))

    wqkv = jnp.concatenate([panel(wq * scale), panel(wk), panel(wv)], axis=1)
    bqkv = jnp.concatenate([jnp.pad(bq * scale, (0, pad)),
                            jnp.pad(bk, (0, pad)),
                            jnp.pad(bv, (0, pad))]).reshape(1, 3 * Ep)
    return wqkv.astype(jnp.bfloat16), bqkv.astype(jnp.float32), E, Ep


def _tpu_generation():
    try:
        kind = jax.devices()[0].device_kind.lower()
    except Exception:
        return 6
    for g in (7, 6, 5, 4):
        if f"v{g}" in kind:
            return g
    return 6


def atom_attention(x, wqkv, bqkv, embed_dim, embed_dim_padded, *, bt=None):
    """x: (B, S, E) float32. wqkv/bqkv from prepare_atom_attention_params()."""
    B, S, E = x.shape
    Ep = embed_dim_padded
    assert E == embed_dim
    gen = _tpu_generation()

    if bt is None:
        # v5e: 4x128^2 MXU -> ~128 rows fills it.  v6e/v7x: 2x256^2 -> aim ~256-512.
        target_rows = 128 if gen <= 5 else 384
        bt = max(1, min(B, target_rows // max(S, 1)))
        # Only v7x has 2 TensorCores per chip; keep >= 2 parallel grid steps there.
        # v5e/v6e run the grid serially, so splitting would just halve MXU row fill.
        if gen >= 7 and B > 1:
            bt = min(bt, pl.cdiv(B, 2))
        # VMEM budget: x/out blocks are double-buffered f32; qkv/q/k/v/scores/ex
        # are live intermediates.  Stay under ~half of physical VMEM.
        budget = ((64 if gen >= 7 else 128) << 20) // 2

        def step_bytes(b):
            io = 2 * 2 * b * S * Ep * 4                 # x + out blocks, 2 buffers
            interm = b * S * (4 * Ep + 3 * Ep) * 4      # qkv f32 + q/k/v copies
            interm += 2 * b * S * S * 4                 # scores + ex
            return io + interm

        while bt > 1 and step_bytes(bt) > budget:
            bt -= 1
    # Clamp to a divisor of B so no grid step computes on padded garbage rows.
    while B % bt != 0:
        bt -= 1
    grid_b = B // bt

    # Lane-pad the embed dim (no-op when E % 128 == 0) so loads/stores are
    # lane-dense and the q/k/v split is panel-aligned.
    xp = x if Ep == E else jnp.pad(x, ((0, 0), (0, 0), (0, Ep - E)))

    x_spec = pl.BlockSpec((bt, S, Ep), lambda b: (b, 0, 0))
    # Grid-invariant weights/bias: single-buffer them (no pointless double-buffer).
    w_spec = pl.BlockSpec((Ep, 3 * Ep), lambda b: (0, 0),
                          pipeline_mode=pl.Buffered(1))
    bias_spec = pl.BlockSpec((1, 3 * Ep), lambda b: (0, 0),
                             pipeline_mode=pl.Buffered(1))

    vmem_limit = (48 << 20) if gen >= 7 else (96 << 20)

    out_p = pl.pallas_call(
        _attn_kernel,
        out_shape=jax.ShapeDtypeStruct((B, S, Ep), x.dtype),
        grid_spec=pltpu.PrefetchScalarGridSpec(
            num_scalar_prefetch=0,
            grid=(grid_b,),
            in_specs=[x_spec, w_spec, bias_spec],
            out_specs=x_spec,
        ),
        compiler_params=pltpu.CompilerParams(
            dimension_semantics=("parallel",),
            vmem_limit_bytes=vmem_limit),
    )(xp, wqkv, bqkv)

    return out_p if Ep == E else out_p[..., :E]


def _reference(x, wq, bq, wk, bk, wv, bv):
    q = x @ wq.T + bq
    k = x @ wk.T + bk
    v = x @ wv.T + bv
    scores = jnp.einsum("bse,bte->bst", q, k) / (x.shape[-1] ** 0.5)
    attn = jax.nn.softmax(scores, axis=-1)
    return jnp.einsum("bst,bte->bse", attn, v) + x


if __name__ == "__main__":
    B, S, E = 2, 8, 32
    key = jax.random.PRNGKey(0)
    kx, kq, kbq, kk, kbk, kv_, kbv = jax.random.split(key, 7)

    x = jax.random.normal(kx, (B, S, E), dtype=jnp.float32)
    # Deterministic synthetic parameters (torch.nn.Linear shapes: W (E, E), b (E,)).
    scale = 1.0 / (E ** 0.5)
    wq = jax.random.normal(kq, (E, E), dtype=jnp.float32) * scale
    bq = jax.random.normal(kbq, (E,), dtype=jnp.float32) * scale
    wk = jax.random.normal(kk, (E, E), dtype=jnp.float32) * scale
    bk = jax.random.normal(kbk, (E,), dtype=jnp.float32) * scale
    wv = jax.random.normal(kv_, (E, E), dtype=jnp.float32) * scale
    bv = jax.random.normal(kbv, (E,), dtype=jnp.float32) * scale

    # One-time weight fusion / lane-padding / scale fold (not paid per forward call).
    wqkv, bqkv, e, ep = prepare_atom_attention_params(wq, bq, wk, bk, wv, bv)

    out = atom_attention(x, wqkv, bqkv, e, ep)
    out = jax.block_until_ready(out)

    ref = _reference(x, wq, bq, wk, bk, wv, bv)
    assert out.shape == (B, S, E)
    # Tolerance accounts for bf16 MXU operands (f32 accumulation) and the EUP
    # approximate reciprocal vs the all-f32 XLA reference; bf16-level accuracy.
    assert jnp.allclose(out, ref, atol=3e-2, rtol=3e-2), "mismatch vs reference"
    print("KERNEL_OK")
</pallas_src>

<mosaic_0001>
module attributes {stable_mosaic.version = 11 : i64} {
  func.func @_attn_kernel(%arg0: i32, %arg1: memref<2x8x128xf32, #tpu.memory_space<vmem>>, %arg2: memref<128x384xbf16, #tpu.memory_space<vmem>>, %arg3: memref<1x384xf32, #tpu.memory_space<vmem>>, %arg4: memref<2x8x128xf32, #tpu.memory_space<vmem>>) attributes {dimension_semantics = [#tpu.dimension_semantics<parallel>], iteration_bounds = array<i64: 1>, scalar_prefetch = 0 : i64, scratch_operands = 0 : i64, tpu.core_type = #tpu.core_type<tc>, window_params = [{transform_indices = @transform_0, window_bounds = array<i64: 2, 8, 128>}, {pipeline_mode = #tpu.pipeline_mode<synchronous>, transform_indices = @transform_1, window_bounds = array<i64: 128, 384>}, {pipeline_mode = #tpu.pipeline_mode<synchronous>, transform_indices = @transform_2, window_bounds = array<i64: 1, 384>}, {transform_indices = @transform_3, window_bounds = array<i64: 2, 8, 128>}]} {
    %c0 = arith.constant 0 : index
    %c0_0 = arith.constant 0 : index
    %c0_1 = arith.constant 0 : index
    %0 = vector.load %arg1[%c0, %c0_0, %c0_1] : memref<2x8x128xf32, #tpu.memory_space<vmem>>, vector<2x8x128xf32>
    %1 = vector.shape_cast %0 : vector<2x8x128xf32> to vector<16x128xf32>
    %2 = arith.truncf %1 : vector<16x128xf32> to vector<16x128xbf16>
    %c0_2 = arith.constant 0 : index
    %c0_3 = arith.constant 0 : index
    %3 = vector.load %arg2[%c0_2, %c0_3] : memref<128x384xbf16, #tpu.memory_space<vmem>>, vector<128x384xbf16>
    %cst = arith.constant dense<0.000000e+00> : vector<16x384xf32>
    %4 = tpu.matmul %2, %3, %cst {dimension_numbers = #tpu.dot_dimension_numbers<[1], [0], [0], [1], [0, 0, 1, 1], [], []>} : vector<16x128xbf16>, vector<128x384xbf16>, vector<16x384xf32> -> vector<16x384xf32>
    %c0_4 = arith.constant 0 : index
    %c0_5 = arith.constant 0 : index
    %5 = vector.load %arg3[%c0_4, %c0_5] : memref<1x384xf32, #tpu.memory_space<vmem>>, vector<1x384xf32>
    %6 = vector.broadcast %5 : vector<1x384xf32> to vector<16x384xf32>
    %7 = arith.addf %4, %6 : vector<16x384xf32>
    %8 = vector.shape_cast %7 : vector<16x384xf32> to vector<2x8x384xf32>
    %9 = vector.extract_strided_slice %8 {offsets = [0, 0, 0], sizes = [2, 8, 128], strides = [1, 1, 1]} : vector<2x8x384xf32> to vector<2x8x128xf32>
    %10 = arith.truncf %9 : vector<2x8x128xf32> to vector<2x8x128xbf16>
    %11 = vector.extract_strided_slice %8 {offsets = [0, 0, 128], sizes = [2, 8, 128], strides = [1, 1, 1]} : vector<2x8x384xf32> to vector<2x8x128xf32>
    %12 = arith.truncf %11 : vector<2x8x128xf32> to vector<2x8x128xbf16>
    %13 = vector.extract_strided_slice %8 {offsets = [0, 0, 256], sizes = [2, 8, 128], strides = [1, 1, 1]} : vector<2x8x384xf32> to vector<2x8x128xf32>
    %14 = arith.truncf %13 : vector<2x8x128xf32> to vector<2x8x128xbf16>
    "tpu.trace_start"() <{level = 10 : i32, message = "bqe,bke->bqk"}> : () -> ()
    %cst_6 = arith.constant dense<0.000000e+00> : vector<2x8x8xf32>
    %15 = tpu.matmul %10, %12, %cst_6 {dimension_numbers = #tpu.dot_dimension_numbers<[2], [2], [1], [1], [0, 0, 0, 1, 1, 1], [0], [0]>} : vector<2x8x128xbf16>, vector<2x8x128xbf16>, vector<2x8x8xf32> -> vector<2x8x8xf32>
    "tpu.trace_stop"() : () -> ()
    %cst_7 = arith.constant dense<0xFF800000> : vector<2x8xf32>
    %16 = vector.multi_reduction <maximumf>, %15, %cst_7 [2] : vector<2x8x8xf32> to vector<2x8xf32>
    %17 = vector.shape_cast %16 : vector<2x8xf32> to vector<2x8x1xf32>
    %18 = vector.broadcast %17 : vector<2x8x1xf32> to vector<2x8x8xf32>
    %19 = arith.subf %15, %18 : vector<2x8x8xf32>
    %20 = math.exp %19 : vector<2x8x8xf32>
    %cst_8 = arith.constant dense<0.000000e+00> : vector<2x8xf32>
    %21 = vector.multi_reduction <add>, %20, %cst_8 [2] : vector<2x8x8xf32> to vector<2x8xf32>
    %22 = vector.shape_cast %21 : vector<2x8xf32> to vector<2x8x1xf32>
    %23 = tpu.reciprocal %22 {approx = true} : vector<2x8x1xf32> -> vector<2x8x1xf32>
    %24 = vector.broadcast %23 : vector<2x8x1xf32> to vector<2x8x8xf32>
    %25 = arith.mulf %20, %24 : vector<2x8x8xf32>
    %26 = arith.truncf %25 : vector<2x8x8xf32> to vector<2x8x8xbf16>
    "tpu.trace_start"() <{level = 10 : i32, message = "bqk,bke->bqe"}> : () -> ()
    %cst_9 = arith.constant dense<0.000000e+00> : vector<2x8x128xf32>
    %27 = tpu.matmul %26, %14, %cst_9 {dimension_numbers = #tpu.dot_dimension_numbers<[2], [1], [1], [2], [0, 0, 0, 1, 1, 2], [0], [0]>} : vector<2x8x8xbf16>, vector<2x8x128xbf16>, vector<2x8x128xf32> -> vector<2x8x128xf32>
    "tpu.trace_stop"() : () -> ()
    %28 = arith.addf %27, %0 : vector<2x8x128xf32>
    %c0_10 = arith.constant 0 : index
    %c0_11 = arith.constant 0 : index
    %c0_12 = arith.constant 0 : index
    %29 = vector.load %arg4[%c0_10, %c0_11, %c0_12] : memref<2x8x128xf32, #tpu.memory_space<vmem>>, vector<2x8x128xf32>
    tpu.vector_store %arg4[%c0_10, %c0_11, %c0_12], %28 {strides = array<i32>} : memref<2x8x128xf32, #tpu.memory_space<vmem>>, vector<2x8x128xf32>,
    return
  }
  func.func @transform_0(%arg0: i32) -> (i32, i32, i32) {
    %c0_i32 = arith.constant 0 : i32
    %c0_i32_0 = arith.constant 0 : i32
    %c0_i32_1 = arith.constant 0 : i32
    return %arg0, %c0_i32, %c0_i32_0 : i32, i32, i32
  }
  func.func @transform_1(%arg0: i32) -> (i32, i32) {
    %c0_i32 = arith.constant 0 : i32
    %c0_i32_0 = arith.constant 0 : i32
    %c0_i32_1 = arith.constant 0 : i32
    return %c0_i32, %c0_i32_0 : i32, i32
  }
  func.func @transform_2(%arg0: i32) -> (i32, i32) {
    %c0_i32 = arith.constant 0 : i32
    %c0_i32_0 = arith.constant 0 : i32
    %c0_i32_1 = arith.constant 0 : i32
    return %c0_i32, %c0_i32_0 : i32, i32
  }
  func.func @transform_3(%arg0: i32) -> (i32, i32, i32) {
    %c0_i32 = arith.constant 0 : i32
    %c0_i32_0 = arith.constant 0 : i32
    %c0_i32_1 = arith.constant 0 : i32
    return %arg0, %c0_i32, %c0_i32_0 : i32, i32, i32
  }
}

</mosaic_0001>

<bundles_post_ra>
// kernel: tpu_custom_call.1
= control target key start
LH: loop header
LB: loop body
LE: loop exit
PB: predicated region body
PF: predicated region fallthrough
CT: control target
= control target key end

     0   :  { %8 = vsyncpa [#allocation3], 0  ;;  %s819_s0 = inlined_call_operand.hbm [shape: f32[2,8,128], index: 0, kind: input, shape index: {}]   ;;  %s820_s1 = inlined_call_operand.hbm [shape: bf16[128,384], index: 1, kind: input, shape index: {}]   ;;  %s821_s2 = inlined_call_operand.vmem [shape: f32[1,384], index: 2, kind: input, shape index: {}]   ;;  %s822_s3 = inlined_call_operand.hbm [shape: f32[2,8,128], index: 3, kind: output, shape index: {}]  }
   0x1   :  { %9 = vsyncpa [#allocation6], 0 }
   0x2   :  { %10 = vsyncpa [#allocation4], 0  ;;  %s735_s12 = smov [#allocation2]  }
   0x3   :  { %s16_s13 = sshll.u32 %s735_s12, 4  ;;  %s17_s13 = int_to_ptr.vmem [resolvable:$true] %s16_s13 }
   0x4   :  { %s677_s14 = scalar_lea.vmem %s17_s13, 256  ;;  %p682_p1 = scmp.lt.s32.totalorder %s17_s13, %s17_s13 }
   0x5   :  { %p678_p0 = scmp.ne.s32.totalorder %s17_s13, %s677_s14  ;;  %p683_p2 = scmp.lt.s32.totalorder %s677_s14, %s677_s14 }
   0x7   :  { %p684_p3 = por %p683_p2, %p682_p1 }
   0x9   :  { %p685_p4 = pnand %p684_p3, %p678_p0 }
   0xb   :  { %688 = shalt.err (!%p685_p4)
}
   0xc   :  { %s736_s15 = smov 128   ;;  %s737_s16 = smov 8  }
   0xd   :  { %22 = dma.hbm_to_vmem [thread:$0]  %s819_s0, 256, %s17_s13, [#allocation3], %s736_s15, %s736_s15, %s737_s16  }
   0xe   :  { %s738_s19 = smov [#allocation5]  }
   0xf   :  { %s28_s20 = sshll.u32 %s738_s19, 4  ;;  %s29_s20 = int_to_ptr.vmem [resolvable:$true] %s28_s20 }
  0x10   :  { %s697_s21 = scalar_lea.vmem %s29_s20, 3072  ;;  %p702_p6 = scmp.lt.s32.totalorder %s29_s20, %s29_s20 }
  0x11   :  { %p698_p5 = scmp.ne.s32.totalorder %s29_s20, %s697_s21  ;;  %p703_p7 = scmp.lt.s32.totalorder %s697_s21, %s697_s21 }
  0x13   :  { %p704_p8 = por %p703_p7, %p702_p6 }
  0x15   :  { %p705_p9 = pnand %p704_p8, %p698_p5 }
  0x17   :  { %708 = shalt.err (!%p705_p9)
}
  0x18   :  { %s739_s22 = smov 192   ;;  %s740_s23 = smov 12  }
  0x19   :  { %34 = dma.hbm_to_vmem [thread:$0]  %s820_s1, 3072, %s29_s20, [#allocation6], %s739_s22, %s739_s22, %s740_s23  }
  0x1a   :  { %729 = dma.done.wait [#allocation3], 256  }
  0x1b   :  { %730 = vsyncadd [#allocation3], 4294967040 }
  0x1c   :  { %731 = dma.done.wait [#allocation6], 3072  }
  0x1d   :  { %732 = vsyncadd [#allocation6], 4294964224  ;;  %v741_v0 = vmov 0   ;;  %v742_v1 = vmov 0.0   ;;  %v629_v2 = vld [vmem:[#allocation5 + $0xac] ss:$12 sps:$4 sm:$0xff]   ;;  %v81_v29 = vlaneseq }
  0x1e   :  { %256 = vmatprep.mubr.bf16.mxu0 %v741_v0  ;;  %575 = vmatprep.subr.bf16.mxu1 %v742_v1  ;;  %v631_v3 = vld [vmem:[#allocation5 + $0xa8] ss:$12 sps:$4 sm:$0xff]   ;;  %v634_v5 = vld [vmem:[#allocation5 + $0x90] ss:$12 sps:$4 sm:$0xff]   ;;  %v637_v7 = vld [vmem:[#allocation5 + $0x78] ss:$12 sps:$4 sm:$0xff]  }
  0x1f   :  { %224 = vmatprep.subr.bf16.mxu0 %v629_v2  ;;  %v632_v4 = vld [vmem:[#allocation5 + $0x94] ss:$12 sps:$4 sm:$0xff]   ;;  %v635_v6 = vld [vmem:[#allocation5 + $0x7c] ss:$12 sps:$4 sm:$0xff]   ;;  %v638_v8 = vld [vmem:[#allocation5 + $0x64] ss:$12 sps:$4 sm:$0xff]  }
  0x20   :  { %225 = vmatpush1.bf16.msra.mxu0 %v631_v3  ;;  %v640_v9 = vld [vmem:[#allocation5 + $0x60] ss:$12 sps:$4 sm:$0xff]   ;;  %v653_v11 = vld [vmem:[#allocation5 + $0xb0] ss:$12 sps:$4 sm:$0xff]   ;;  %v654_v12 = vld [vmem:[#allocation5 + $0x98] ss:$12 sps:$4 sm:$0xff]  }
  0x21   :  { %226 = vmatprep.subr.bf16.mxu0 %v632_v4  ;;  %v641_v10 = vld [vmem:[#allocation5 + $0x4c] ss:$12 sps:$4 sm:$0xff]   ;;  %576 = vmatpush3.bf16.msra.mxu1 %v653_v11  ;;  %v643_v13 = vld [vmem:[#allocation5 + $0x48] ss:$12 sps:$4 sm:$0xff]   ;;  %v646_v16 = vld [vmem:[#allocation5 + $0x30] ss:$12 sps:$4 sm:$0xff]  }
  0x22   :  { %577 = vmatprep.subr.bf16.mxu1 %v742_v1  ;;  %v644_v14 = vld [vmem:[#allocation5 + $0x34] ss:$12 sps:$4 sm:$0xff]   ;;  %v647_v17 = vld [vmem:[#allocation5 + $0x1c] ss:$12 sps:$4 sm:$0xff]   ;;  %v649_v19 = vld [vmem:[#allocation5 + $0x18] ss:$12 sps:$4 sm:$0xff]  }
  0x23   :  { %v655_v15 = vld [vmem:[#allocation5 + $0x80] ss:$12 sps:$4 sm:$0xff]   ;;  %v656_v18 = vld [vmem:[#allocation5 + $0x68] ss:$12 sps:$4 sm:$0xff]   ;;  %v650_v20 = vld [vmem:[#allocation5 + $0x4] ss:$12 sps:$4 sm:$0xff]  }
  0x24   :  { %227 = vmatpush1.bf16.msra.mxu0 %v634_v5  ;;  %v657_v21 = vld [vmem:[#allocation5 + $0x50] ss:$12 sps:$4 sm:$0xff]   ;;  %v652_v22 = vld [vmem:[#allocation5] ss:$12 sps:$4 sm:$0xff]   ;;  %v658_v26 = vld [vmem:[#allocation5 + $0x38] ss:$12 sps:$4 sm:$0xff]  }
  0x25   :  { %228 = vmatprep.subr.bf16.mxu0 %v635_v6  ;;  %578 = vmatpush3.bf16.msra.mxu1 %v654_v12  ;;  %v778_v23 = vld [vmem:[#allocation2] sm:$0xff]  ;;  %v780_v24 = vld [vmem:[#allocation2 + $0x8] sm:$0xff]  ;;  %v659_v27 = vld [vmem:[#allocation5 + $0x20] ss:$12 sps:$4 sm:$0xff]   ;;  %vm743_vm0 = vmmov 0   ;;  %v82_v30 = vshrl.u32 %v81_v29, 7 }
  0x26   :  { %579 = vmatprep.subr.bf16.mxu1 %v742_v1  ;;  %v46_v25 = vpack.c.bf16 %v780_v24, %v778_v23  ;;  %v660_v28 = vld [vmem:[#allocation5 + $0x8] ss:$12 sps:$4 sm:$0xff]   ;;  %591 = vmatprep.mubr.msk.bf16.mxu1 %vm743_vm0, %v742_v1  ;;  %v79_v32 = vld [vmem:[%s821_s2] sm:$0x7]  ;;  %vm422_vm1 = vcmask 1043456   ;;  %vm394_vm2 = vcmask 64512  }
  0x27   :  { %v87_v31 = vsub.s32 1, %v82_v30  ;;  %v83_v34 = vsub.s32 0, %v82_v30  ;;  %v91_v48 = vsub.s32 2, %v82_v30  ;;  %s744_s2 = smov [#allocation7]  }
  0x28   :  { %229 = vmatpush1.bf16.msra.mxu0 %v637_v7  ;;  %s519_s26 = sshll.u32 %s744_s2, 4  ;;  %s520_s26 = int_to_ptr.vmem [resolvable:$true] %s519_s26 }
  0x29   :  { %230 = vmatprep.subr.bf16.mxu0 %v638_v8  ;;  %580 = vmatpush3.bf16.msra.mxu1 %v655_v15  ;;  %v88_v33 = vrot.slane %v79_v32, %v87_v31  ;;  %v84_v38 = vrot.slane %v79_v32, %v83_v34  ;;  %v92_v49 = vrot.slane %v79_v32, %v91_v48  ;;  %s709_s27 = scalar_lea.vmem %s520_s26, 256  ;;  %p714_p11 = scmp.lt.s32.totalorder %s520_s26, %s520_s26 }
  0x2a   :  { %581 = vmatprep.subr.bf16.mxu1 %v742_v1  ;;  %p710_p10 = scmp.ne.s32.totalorder %s520_s26, %s709_s27  ;;  %p715_p12 = scmp.lt.s32.totalorder %s709_s27, %s709_s27 }
  0x2c   :  { %231 = vmatpush1.bf16.msra.mxu0 %v640_v9  ;;  %p716_p13 = por %p715_p12, %p714_p11 }
  0x2d   :  { %232 = vmatprep.subr.bf16.mxu0 %v641_v10  ;;  %582 = vmatpush3.bf16.msra.mxu1 %v656_v18 }
  0x2e   :  { %583 = vmatprep.subr.bf16.mxu1 %v742_v1  ;;  %p717_p0 = pnand %p716_p13, %p710_p10 }
  0x30   :  { %233 = vmatpush1.bf16.msra.mxu0 %v643_v13 }
  0x31   :  { %234 = vmatprep.subr.bf16.mxu0 %v644_v14  ;;  %584 = vmatpush3.bf16.msra.mxu1 %v657_v21 }
  0x32   :  { %585 = vmatprep.subr.bf16.mxu1 %v742_v1 }
  0x34   :  { %235 = vmatpush1.bf16.msra.mxu0 %v646_v16 }
  0x35   :  { %236 = vmatprep.subr.bf16.mxu0 %v647_v17  ;;  %586 = vmatpush3.bf16.msra.mxu1 %v658_v26 }
  0x36   :  { %587 = vmatprep.subr.bf16.mxu1 %v742_v1 }
  0x38   :  { %237 = vmatpush1.bf16.msra.mxu0 %v649_v19 }
  0x39   :  { %238 = vmatprep.subr.bf16.mxu0 %v650_v20  ;;  %588 = vmatpush3.bf16.msra.mxu1 %v659_v27 }
  0x3a   :  { %589 = vmatprep.subr.bf16.mxu1 %v742_v1 }
  0x3c   :  { %239 = vmatpush1.bf16.msra.mxu0 %v652_v22 }
  0x3d   :  { %595 = vmatprep.subr.bf16.mxu0 %v742_v1  ;;  %590 = vmatpush3.bf16.msra.mxu1 %v660_v28 }
  0x3e   :  { %601 = vmatprep.subr.bf16.mxu1 %v742_v1 }
  0x3f   :  { %257 = vmatmul.mubr.bf16.vlgmr.msra.gmra.mxu0 %v46_v25 }
  0x40   :  { %597 = vmatprep.mubr.msk.bf16.mxu0 %vm743_vm0, %v742_v1  ;;  %592 = vmatmul.mubr.bf16.vlgmr.msra.gmra.mxu1 %v46_v25 }
  0x41   :  { %603 = vmatprep.mubr.msk.bf16.mxu1 %vm743_vm0, %v742_v1 }
  0xff   :  { %v258_v35 = vpop.f32.mrf.mxu0 }
 0x100   :  { %v259_v43 = vadd.f32 %v258_v35, %v84_v38  ;;  %v301_v50 = vpop.f32.mrf.mxu1 }
 0x101   :  { %v260_v36 = vpop.f32.mrf.mxu0  ;;  %v302_v51 = vadd.f32 %v301_v50, %v92_v49 }
 0x102   :  { %v261_v37 = vadd.f32 %v260_v36, %v88_v33  ;;  %v308_v45 = vpack.c.bf16 %v259_v43, %v259_v43  ;;  %v593_v52 = vpop.f32.mrf.mxu1 }
 0x103   :  { %v262_v39 = vpop.f32.mrf.mxu0  ;;  %v312_v53 = vpack.c.bf16 %v302_v51, %v302_v51 }
 0x104   :  { %v310_v40 = vpack.c.bf16 %v261_v37, %v261_v37  ;;  %v263_v46 = vadd.f32 %v262_v39, %v84_v38  ;;  %v304_v54 = vpop.f32.mrf.mxu1 }
 0x105   :  { %v264_v41 = vpop.f32.mrf.mxu0  ;;  %v424_v55 = vsel %vm422_vm1, %v312_v53, 0  ;;  %v305_v56 = vadd.f32 %v304_v54, %v92_v49 }
 0x106   :  { %v265_v42 = vadd.f32 %v264_v41, %v88_v33  ;;  %596 = vmatpush3.bf16.xpose.msra.mxu0 %v310_v40  ;;  %v309_v47 = vpack.c.bf16 %v263_v46, %v263_v46  ;;  %v594_v57 = vpop.f32.mrf.mxu1 }
 0x107   :  { %607 = vmatprep.subr.bf16.mxu0 %v742_v1  ;;  %v313_v58 = vpack.c.bf16 %v305_v56, %v305_v56 }
 0x108   :  { %v311_v44 = vpack.c.bf16 %v265_v42, %v265_v42 }
 0x109   :  { %v470_v59 = vsel %vm422_vm1, %v313_v58, 0 }
 0x10a   :  { %602 = vmatpush3.bf16.xpose.msra.mxu1 %v311_v44 }
 0x10b   :  { %613 = vmatprep.subr.bf16.mxu1 %v742_v1 }
 0x10d   :  { %598 = vmatmul.mubr.bf16.vlgmr.msra.gmra.mxu0 %v308_v45 }
 0x10e   :  { %609 = vmatprep.mubr.msk.bf16.mxu0 %vm743_vm0, %v742_v1  ;;  %608 = vmatpush3.bf16.msra.mxu0 %v424_v55 }
 0x111   :  { %604 = vmatmul.mubr.bf16.vlgmr.msra.gmra.mxu1 %v309_v47 }
 0x112   :  { %615 = vmatprep.mubr.msk.bf16.mxu1 %vm743_vm0, %v742_v1  ;;  %614 = vmatpush3.bf16.msra.mxu1 %v470_v59 }
 0x1cd   :  { %v348_v60 = vpop.f32.mrf.mxu0 }
 0x1ce   :  { %v395_v61 = vsel %vm394_vm2, %v348_v60, -inf }
 0x1cf   :  { %396 = vmax.xlane.f32.xlu0 %v395_v61  ;;  %v599_v62 = vpop.f32.mrf.mxu0 }
 0x1d1   :  { %v351_v63 = vpop.f32.mrf.mxu0  ;;  %v388_v0 = vpop.f32.mrf.mxu1 }
 0x1d2   :  { %v398_v1 = vsel %vm394_vm2, %v388_v0, -inf }
 0x1d3   :  { %v605_v2 = vpop.f32.mrf.mxu1  ;;  %399 = vmax.xlane.f32.xlu0 %v398_v1  ;;  %v600_v3 = vpop.f32.mrf.mxu0 }
 0x1d5   :  { %v391_v4 = vpop.f32.mrf.mxu1 }
 0x1d7   :  { %v606_v5 = vpop.f32.mrf.mxu1 }
 0x258   :  { %v397_v6 = vpop.xlane.xlu0 %396 }
 0x259   :  { %v401_v7 = vsub.f32 %v348_v60, %v397_v6 }
 0x25b   :  { %v403_v8 = vmul.f32 1.442695, %v401_v7 }
 0x25c   :  { %v400_v9 = vpop.xlane.xlu0 %399 }
 0x25d   :  { %661 = vpow2.f32 %v403_v8  ;;  %v402_v10 = vsub.f32 %v388_v0, %v400_v9 }
 0x25f   :  { %v405_v11 = vmul.f32 1.442695, %v402_v10 }
 0x261   :  { %663 = vpow2.f32 %v405_v11 }
 0x26a   :  { %v662_v12 = vpop.eup %661 }
 0x26b   :  { %v407_v13 = vsel %vm394_vm2, %v662_v12, 0.0 }
 0x26c   :  { %408 = vadd.xlane.f32.xlu1 %v407_v13 }
 0x26e   :  { %v664_v14 = vpop.eup %663 }
 0x26f   :  { %v410_v15 = vsel %vm394_vm2, %v664_v14, 0.0 }
 0x270   :  { %411 = vadd.xlane.f32.xlu1 %v410_v15 }
 0x2f5   :  { %v409_v16 = vpop.xlane.xlu1 %408 }
 0x2f6   :  { %665 = vrcp.f32 %v409_v16 }
 0x2f9   :  { %v412_v17 = vpop.xlane.xlu1 %411 }
 0x2fa   :  { %667 = vrcp.f32 %v412_v17 }
 0x303   :  { %v666_v18 = vpop.eup %665 }
 0x304   :  { %v415_v19 = vmul.f32 %v666_v18, %v662_v12 }
 0x306   :  { %v417_v20 = vpack.c.bf16 %v415_v19, %v415_v19 }
 0x307   :  { %v668_v21 = vpop.eup %667 }
 0x308   :  { %610 = vmatmul.mubr.msk.bf16.vlgmr.msra.gmra.mxu0 %vm394_vm2, %v417_v20  ;;  %v416_v22 = vmul.f32 %v668_v21, %v664_v14 }
 0x30a   :  { %v418_v25 = vpack.c.bf16 %v416_v22, %v416_v22 }
 0x30c   :  { %616 = vmatmul.mubr.msk.bf16.vlgmr.msra.gmra.mxu1 %vm394_vm2, %v418_v25 }
 0x3c8   :  { %v460_v26 = vpop.f32.mrf.mxu0 }
 0x3c9   :  { %v461_v27 = vadd.f32 %v460_v26, %v778_v23 }
 0x3ca   :  { %v611_v28 = vpop.f32.mrf.mxu0 }
 0x3cb   :  { %512 = vst [vmem:[#allocation7] sm:$0xff] %v461_v27 }
 0x3cc   :  { %v463_v29 = vpop.f32.mrf.mxu0  ;;  %v506_v30 = vpop.f32.mrf.mxu1 }
 0x3cd   :  { %v507_v31 = vadd.f32 %v506_v30, %v780_v24 }
 0x3ce   :  { %v612_v32 = vpop.f32.mrf.mxu0  ;;  %v617_v33 = vpop.f32.mrf.mxu1 }
 0x3cf   :  { %513 = vst [vmem:[#allocation7 + $0x8] sm:$0xff] %v507_v31 }
 0x3d0   :  { %v509_v34 = vpop.f32.mrf.mxu1 }
 0x3d1   :  { %720 = shalt.err (!%p717_p0)
}
 0x3d2   :  { %525 = dma.vmem_to_hbm [thread:$0]  %s520_s26, 256, %s822_s3, [#allocation4], %s736_s15, %s736_s15, %s737_s16   ;;  %v618_v23 = vpop.f32.mrf.mxu1 }
 0x3d3   :  { %733 = dma.done.wait [#allocation4], 256  }
 0x3d4   :  { %734 = vsyncadd [#allocation4], 4294967040 }
 0x3d5   :  { %529 = vsyncpa [#allocation3], 1 }
 0x3d6   :  { %530 = vsyncpa [#allocation6], 1 }
 0x3d7   :  { %531 = vsyncpa [#allocation4], 1 }

</bundles_post_ra>
